<compile_context>
chip_gen: v7x
topology: tpu7x:2x2x1
jax: 0.10.0
libtpu: 0.0.40
codegen_flags: <defaults>
</compile_context>

<pallas_src>
import functools

import numpy as np
import jax
import jax.numpy as jnp
from jax import lax
from jax.experimental import pallas as pl
from jax.experimental.pallas import tpu as pltpu


def _make_kernel_np(k):
    """NumPy port of make_kernel()."""
    k = np.asarray(k, dtype=np.float32)
    if k.ndim == 1:
        k = k[None, :] * k[:, None]
    k = k / k.sum()
    return k


def _try_separate(k2d):
    """Return (ky1, kx1) with outer(ky1, kx1) == k2d, or None if not rank-1."""
    k = np.asarray(k2d, np.float64)
    i0, j0 = np.unravel_index(np.argmax(np.abs(k)), k.shape)
    piv = k[i0, j0]
    if piv == 0.0:
        return None
    ky = k[:, j0] / piv
    kx = k[i0, :]
    if np.allclose(np.outer(ky, kx), k, rtol=1e-6, atol=1e-7 * abs(piv)):
        return ky.astype(np.float32), kx.astype(np.float32)
    return None


def _build_row_phase_taps_2d(kf, up, pad0):
    """Per output-row-phase taps (dense 2-D path). kf = flipped (kh,kw) taps."""
    kh, kw = kf.shape
    ytaps, d_all = [], []
    for ry in range(up):
        ky0 = (pad0 - ry) % up
        taps = []
        for ky in range(ky0, kh, up):
            dy = (ry + ky - pad0) // up          # exact by construction
            taps.append((dy, [float(kf[ky, kx]) for kx in range(kw)]))
            d_all.append(dy)
        ytaps.append(taps)
    halo_lo = max(0, -min(d_all)) if d_all else 0
    halo_hi = max(0, max(d_all)) if d_all else 0
    return ytaps, halo_lo, halo_hi


def _build_row_phase_taps_1d(kyf, up, pad0):
    """Per output-row-phase (dy, weight) taps for the separable path."""
    kh = kyf.shape[0]
    ytaps, d_all = [], []
    for ry in range(up):
        ky0 = (pad0 - ry) % up
        taps = []
        for ky in range(ky0, kh, up):
            dy = (ry + ky - pad0) // up
            taps.append((dy, float(kyf[ky])))
            d_all.append(dy)
        ytaps.append(taps)
    halo_lo = max(0, -min(d_all)) if d_all else 0
    halo_hi = max(0, max(d_all)) if d_all else 0
    return ytaps, halo_lo, halo_hi


def _pick_plane_batch(nc, bytes_per_plane, budget_bytes=4 * 1024 * 1024, bmax=256):
    """Largest divisor of nc whose per-step VMEM footprint fits the budget."""
    cap = max(1, min(bmax, budget_bytes // max(bytes_per_plane, 1)))
    b = 1
    for d in range(1, min(nc, cap) + 1):
        if nc % d == 0:
            b = d
    return b


def _upfirdn_up_sep_kernel(x_ref, o_ref, *, kxf, ytaps, halo_lo, h, out_w, kw):
    """Separable two-stage polyphase FIR upsample of a batch of planes.

    x_ref : (B, hp, wW)  W-zero-inserted + W-padded planes with H halo rows.
    o_ref : (B, h, up*out_w)  row-major view of the final (B, up*h, out_w) block:
            lanes [ry*out_w, (ry+1)*out_w) of row q hold output row up*q + ry.
    """
    b, hp, _ = x_ref.shape
    # Stage A: 1-D FIR along W (lanes), shared across all output row phases.
    tc = jnp.zeros((b, hp, out_w), jnp.float32)
    for kx in range(kw):
        wk = kxf[kx]
        if wk != 0.0:                            # skip structurally-zero taps
            tc = tc + wk * x_ref[:, :, kx:kx + out_w].astype(jnp.float32)
    # Stage B: row-polyphase 1-D FIR along H.
    phase_rows = []
    for taps in ytaps:                           # one entry per output row phase
        acc = jnp.zeros((b, h, out_w), jnp.float32)
        for dy, wy in taps:                      # ceil(kh/up) row taps per phase
            if wy != 0.0:
                r0 = dy + halo_lo
                acc = acc + wy * tc[:, r0:r0 + h, :]
        phase_rows.append(acc)
    # Single lane-dense full-block store (phases concatenated along lanes).
    o_ref[...] = jnp.concatenate(phase_rows, axis=-1).astype(o_ref.dtype)


def _upfirdn_up_dense_kernel(x_ref, o_ref, *, ytaps, halo_lo, h, out_w, kw):
    """Dense 2-D tap fallback (non-separable FIR kernels). Same I/O layout."""
    b = x_ref.shape[0]
    phase_rows = []
    for taps in ytaps:
        acc = jnp.zeros((b, h, out_w), jnp.float32)
        for dy, wrow in taps:
            r0 = dy + halo_lo
            for kx in range(kw):
                wk = wrow[kx]
                if wk != 0.0:
                    acc = acc + wk * x_ref[:, r0:r0 + h, kx:kx + out_w].astype(jnp.float32)
        phase_rows.append(acc)
    o_ref[...] = jnp.concatenate(phase_rows, axis=-1).astype(o_ref.dtype)


def upfirdn2d_up_pallas(x, kernel2d, factor, pad):
    """upfirdn2d(x, kernel2d, up=factor, down=1, pad=pad) for NCHW input."""
    n, c, h, w = x.shape
    kh, kw = kernel2d.shape
    pad0, pad1 = pad
    up = factor
    assert pad0 >= 0 and pad1 >= 0, "negative pads not supported"
    out_h = h * up + pad0 + pad1 - kh + 1
    out_w = w * up + pad0 + pad1 - kw + 1
    # The Upsample padding formula guarantees out_h == up*h, which is what makes
    # the (NC, h, up*out_w) output view a pure reshape of (NC, out_h, out_w).
    assert out_h == h * up, "Upsample pad convention expected (out_h == up*h)"

    k2d = np.asarray(kernel2d, np.float32)
    kf = np.ascontiguousarray(k2d[::-1, ::-1])   # conv2d is cross-correlation -> flip
    sep = _try_separate(k2d)
    if sep is not None:
        ky1, kx1 = sep
        kyf = np.ascontiguousarray(ky1[::-1])
        kxf = np.ascontiguousarray(kx1[::-1])
        ytaps, halo_lo, halo_hi = _build_row_phase_taps_1d(kyf, up, pad0)
        body = functools.partial(_upfirdn_up_sep_kernel,
                                 kxf=[float(v) for v in kxf],
                                 ytaps=ytaps, halo_lo=halo_lo,
                                 h=h, out_w=out_w, kw=kw)
        tmp_f32 = (h + halo_lo + halo_hi) * out_w        # stage-A intermediate
    else:
        ytaps, halo_lo, halo_hi = _build_row_phase_taps_2d(kf, up, pad0)
        body = functools.partial(_upfirdn_up_dense_kernel,
                                 ytaps=ytaps, halo_lo=halo_lo,
                                 h=h, out_w=out_w, kw=kw)
        tmp_f32 = 0

    nc = n * c
    hp = h + halo_lo + halo_hi                   # input rows incl. zero halo
    wW = w * up + pad0 + pad1                    # zero-inserted + padded width

    # --- wrapper glue: one lax.pad (interior pad = zero-insert along W,
    # edge pad = FIR pad along W + zero halo rows along H). ---
    xf = x.reshape(nc, h, w)
    xwp = lax.pad(xf, jnp.zeros((), x.dtype),
                  ((0, 0, 0),
                   (halo_lo, halo_hi, 0),
                   (pad0, pad1 + up - 1, up - 1)))
    assert xwp.shape == (nc, hp, wW)

    itemsize = np.dtype(x.dtype).itemsize
    in_plane = hp * wW * itemsize
    out_plane = h * up * out_w * itemsize
    acc_f32 = up * h * out_w                     # per-phase f32 accumulators
    bytes_per_plane = 2 * (in_plane + out_plane) + 4 * (tmp_f32 + acc_f32)
    bsz = _pick_plane_batch(nc, bytes_per_plane)
    grid = (nc // bsz,)

    out = pl.pallas_call(
        body,
        # Row-major view of the final (nc, out_h, out_w) output: free reshape below.
        out_shape=jax.ShapeDtypeStruct((nc, h, up * out_w), x.dtype),
        grid_spec=pltpu.PrefetchScalarGridSpec(
            num_scalar_prefetch=0,
            grid=grid,
            in_specs=[pl.BlockSpec((bsz, hp, wW), lambda i: (i, 0, 0))],
            out_specs=pl.BlockSpec((bsz, h, up * out_w), lambda i: (i, 0, 0)),
        ),
        compiler_params=pltpu.CompilerParams(
            dimension_semantics=("parallel",),
            vmem_limit_bytes=32 * 1024 * 1024,
        ),
    )(xwp)

    return out.reshape(n, c, out_h, out_w)


class Upsample:
    """JAX/Pallas port of the PyTorch Upsample module."""

    def __init__(self, kernel, factor=2):
        self.factor = factor
        k = _make_kernel_np(kernel) * (factor ** 2)
        self.kernel = k                           # deterministic buffer, built in-script
        p = k.shape[0] - factor
        pad0 = (p + 1) // 2 + factor - 1
        pad1 = p // 2
        self.pad = (pad0, pad1)
        self._fn = jax.jit(functools.partial(
            upfirdn2d_up_pallas, kernel2d=self.kernel, factor=self.factor, pad=self.pad))

    def __call__(self, x):
        return self._fn(x)


def _upsample_ref_np(x, k2d, factor, pad):
    """Pure-NumPy reference (same math as upfirdn2d_native with down=1)."""
    x = np.asarray(x, np.float32)
    n, c, h, w = x.shape
    kh, kw = k2d.shape
    pad0, pad1 = pad
    z = np.zeros((n, c, h * factor, w * factor), np.float32)
    z[:, :, ::factor, ::factor] = x
    zp = np.pad(z, ((0, 0), (0, 0), (pad0, pad1), (pad0, pad1)))
    kf = k2d[::-1, ::-1]
    out_h = h * factor + pad0 + pad1 - kh + 1
    out_w = w * factor + pad0 + pad1 - kw + 1
    out = np.zeros((n, c, out_h, out_w), np.float32)
    for ky in range(kh):
        for kx in range(kw):
            out += kf[ky, kx] * zp[:, :, ky:ky + out_h, kx:kx + out_w]
    return out


if __name__ == "__main__":
    key = jax.random.PRNGKey(0)
    x = jax.random.normal(key, (2, 4, 16, 16), dtype=jnp.float32)

    # Standard StyleGAN2 blur kernel (1-D -> separable fast path).
    up2 = Upsample(kernel=[1, 3, 3, 1], factor=2)
    y = jax.block_until_ready(up2(x))
    assert y.shape == (2, 4, 32, 32), y.shape
    y_ref = _upsample_ref_np(np.asarray(x), up2.kernel, up2.factor, up2.pad)
    np.testing.assert_allclose(np.asarray(y), y_ref, rtol=1e-5, atol=1e-5)

    # Non-separable 2-D kernel exercises the dense fallback body.
    up3 = Upsample(kernel=[[1.0, 2.0, 0.0], [2.0, 4.0, 2.0], [0.0, 2.0, 1.0]], factor=2)
    y2 = jax.block_until_ready(up3(x))
    assert y2.shape == (2, 4, 32, 32), y2.shape
    y2_ref = _upsample_ref_np(np.asarray(x), up3.kernel, up3.factor, up3.pad)
    np.testing.assert_allclose(np.asarray(y2), y2_ref, rtol=1e-5, atol=1e-5)

    print("KERNEL_OK")
</pallas_src>

<mosaic_0001>
module attributes {stable_mosaic.version = 11 : i64} {
  func.func @_upfirdn_up_sep_kernel(%arg0: i32, %arg1: memref<8x18x35xf32, #tpu.memory_space<vmem>>, %arg2: memref<8x16x64xf32, #tpu.memory_space<vmem>>) attributes {dimension_semantics = [#tpu.dimension_semantics<parallel>], iteration_bounds = array<i64: 1>, scalar_prefetch = 0 : i64, scratch_operands = 0 : i64, tpu.core_type = #tpu.core_type<tc>, window_params = [{transform_indices = @transform_0, window_bounds = array<i64: 8, 18, 35>}, {transform_indices = @transform_1, window_bounds = array<i64: 8, 16, 64>}]} {
    %cst = arith.constant 0.000000e+00 : f32
    %0 = vector.broadcast %cst : f32 to vector<8x18x32xf32>
    %c0 = arith.constant 0 : index
    %c0_0 = arith.constant 0 : index
    %c0_1 = arith.constant 0 : index
    %1 = vector.load %arg1[%c0, %c0_0, %c0_1] : memref<8x18x35xf32, #tpu.memory_space<vmem>>, vector<8x18x32xf32>
    %cst_2 = arith.constant 1.875000e-01 : f32
    %2 = vector.broadcast %cst_2 : f32 to vector<8x18x32xf32>
    %3 = arith.mulf %2, %1 : vector<8x18x32xf32>
    %4 = arith.addf %0, %3 : vector<8x18x32xf32>
    %c0_3 = arith.constant 0 : index
    %c0_4 = arith.constant 0 : index
    %c1 = arith.constant 1 : index
    %5 = vector.load %arg1[%c0_3, %c0_4, %c1] : memref<8x18x35xf32, #tpu.memory_space<vmem>>, vector<8x18x32xf32>
    %cst_5 = arith.constant 5.625000e-01 : f32
    %6 = vector.broadcast %cst_5 : f32 to vector<8x18x32xf32>
    %7 = arith.mulf %6, %5 : vector<8x18x32xf32>
    %8 = arith.addf %4, %7 : vector<8x18x32xf32>
    %c0_6 = arith.constant 0 : index
    %c0_7 = arith.constant 0 : index
    %c2 = arith.constant 2 : index
    %9 = vector.load %arg1[%c0_6, %c0_7, %c2] : memref<8x18x35xf32, #tpu.memory_space<vmem>>, vector<8x18x32xf32>
    %cst_8 = arith.constant 5.625000e-01 : f32
    %10 = vector.broadcast %cst_8 : f32 to vector<8x18x32xf32>
    %11 = arith.mulf %10, %9 : vector<8x18x32xf32>
    %12 = arith.addf %8, %11 : vector<8x18x32xf32>
    %c0_9 = arith.constant 0 : index
    %c0_10 = arith.constant 0 : index
    %c3 = arith.constant 3 : index
    %13 = vector.load %arg1[%c0_9, %c0_10, %c3] : memref<8x18x35xf32, #tpu.memory_space<vmem>>, vector<8x18x32xf32>
    %cst_11 = arith.constant 1.875000e-01 : f32
    %14 = vector.broadcast %cst_11 : f32 to vector<8x18x32xf32>
    %15 = arith.mulf %14, %13 : vector<8x18x32xf32>
    %16 = arith.addf %12, %15 : vector<8x18x32xf32>
    %cst_12 = arith.constant 0.000000e+00 : f32
    %17 = vector.broadcast %cst_12 : f32 to vector<8x16x32xf32>
    %18 = vector.extract_strided_slice %16 {offsets = [0, 0, 0], sizes = [8, 16, 32], strides = [1, 1, 1]} : vector<8x18x32xf32> to vector<8x16x32xf32>
    %cst_13 = arith.constant 0.333333343 : f32
    %19 = vector.broadcast %cst_13 : f32 to vector<8x16x32xf32>
    %20 = arith.mulf %19, %18 : vector<8x16x32xf32>
    %21 = arith.addf %17, %20 : vector<8x16x32xf32>
    %22 = vector.extract_strided_slice %16 {offsets = [0, 1, 0], sizes = [8, 16, 32], strides = [1, 1, 1]} : vector<8x18x32xf32> to vector<8x16x32xf32>
    %cst_14 = arith.constant 1.000000e+00 : f32
    %23 = vector.broadcast %cst_14 : f32 to vector<8x16x32xf32>
    %24 = arith.mulf %23, %22 : vector<8x16x32xf32>
    %25 = arith.addf %21, %24 : vector<8x16x32xf32>
    %cst_15 = arith.constant 0.000000e+00 : f32
    %26 = vector.broadcast %cst_15 : f32 to vector<8x16x32xf32>
    %27 = vector.extract_strided_slice %16 {offsets = [0, 1, 0], sizes = [8, 16, 32], strides = [1, 1, 1]} : vector<8x18x32xf32> to vector<8x16x32xf32>
    %cst_16 = arith.constant 1.000000e+00 : f32
    %28 = vector.broadcast %cst_16 : f32 to vector<8x16x32xf32>
    %29 = arith.mulf %28, %27 : vector<8x16x32xf32>
    %30 = arith.addf %26, %29 : vector<8x16x32xf32>
    %31 = vector.extract_strided_slice %16 {offsets = [0, 2, 0], sizes = [8, 16, 32], strides = [1, 1, 1]} : vector<8x18x32xf32> to vector<8x16x32xf32>
    %cst_17 = arith.constant 0.333333343 : f32
    %32 = vector.broadcast %cst_17 : f32 to vector<8x16x32xf32>
    %33 = arith.mulf %32, %31 : vector<8x16x32xf32>
    %34 = arith.addf %30, %33 : vector<8x16x32xf32>
    %35 = tpu.concatenate %25, %34 in 2 : vector<8x16x32xf32>, vector<8x16x32xf32> -> vector<8x16x64xf32>
    %c0_18 = arith.constant 0 : index
    %c0_19 = arith.constant 0 : index
    %c0_20 = arith.constant 0 : index
    %36 = vector.load %arg2[%c0_18, %c0_19, %c0_20] : memref<8x16x64xf32, #tpu.memory_space<vmem>>, vector<8x16x64xf32>
    tpu.vector_store %arg2[%c0_18, %c0_19, %c0_20], %35 {strides = array<i32>} : memref<8x16x64xf32, #tpu.memory_space<vmem>>, vector<8x16x64xf32>,
    return
  }
  func.func @transform_0(%arg0: i32) -> (i32, i32, i32) {
    %c0_i32 = arith.constant 0 : i32
    %c0_i32_0 = arith.constant 0 : i32
    %c0_i32_1 = arith.constant 0 : i32
    return %arg0, %c0_i32, %c0_i32_0 : i32, i32, i32
  }
  func.func @transform_1(%arg0: i32) -> (i32, i32, i32) {
    %c0_i32 = arith.constant 0 : i32
    %c0_i32_0 = arith.constant 0 : i32
    %c0_i32_1 = arith.constant 0 : i32
    return %arg0, %c0_i32, %c0_i32_0 : i32, i32, i32
  }
}

</mosaic_0001>

<bundles_post_ra>
// kernel: upfirdn2d_up_pallas.1
= control target key start
LH: loop header
LB: loop body
LE: loop exit
PB: predicated region body
PF: predicated region fallthrough
CT: control target
= control target key end

     0   :  { %s867_s14 = smov 127   ;;  %s868_s27 = smov 126   ;;  %vm496_vm0 = vcmask 1046528   ;;  %vm825_vm1 = vcmask 261120   ;;  %vm842_vm2 = vcmask 523264   ;;  %s1558_s0 = inlined_call_operand.vmem [shape: f32[8,18,35], index: 0, kind: input, shape index: {}]   ;;  %s1559_s1 = inlined_call_operand.vmem [shape: f32[8,16,64], index: 1, kind: output, shape index: {}]  }
   0x1   :  { %v884_v0 = vld [vmem:[%s1558_s0 + $0x10] sm:$0x3]  ;;  %v889_v1 = vld [vmem:[%s1558_s0] sm:$0xff]  ;;  %v894_v2 = vld [vmem:[%s1558_s0 + $0x18] sm:$0xff] }
   0x2   :  { %v897_v3 = vmul.f32 0.5625, %v884_v0  ;;  %v900_v4 = vmul.f32 0.5625, %v889_v1  ;;  %v905_v5 = vld [vmem:[%s1558_s0 + $0x8] sm:$0xff]  ;;  %v912_v6 = vmul.f32 0.5625, %v894_v2  ;;  %v925_v9 = vld [vmem:[%s1558_s0 + $0x20] sm:$0xff]  ;;  %v936_v12 = vld [vmem:[%s1558_s0 + $0x38] sm:$0xff] }
   0x3   :  { %v915_v7 = vmul.f32 0.5625, %v905_v5  ;;  %v920_v8 = vld [vmem:[%s1558_s0 + $0x28] sm:$0x3]  ;;  %v84_v11 = vmul.f32 0.5625, %v925_v9  ;;  %v941_v13 = vld [vmem:[%s1558_s0 + $0x30] sm:$0xff]  ;;  %v87_v14 = vmul.f32 0.5625, %v936_v12 }
   0x4   :  { %132 = vrot.lane.b32.xlu1 %v897_v3, %s867_s14  ;;  %128 = vrot.lane.b32.xlu0 %v900_v4, %s867_s14  ;;  %v85_v10 = vmul.f32 0.5625, %v920_v8  ;;  %v86_v15 = vmul.f32 0.5625, %v941_v13  ;;  %v950_v16 = vld [vmem:[%s1558_s0 + $0x48] sm:$0xff]  ;;  %v955_v17 = vld [vmem:[%s1558_s0 + $0x40] sm:$0x3]  ;;  %v32_v48 = vmul.f32 0.1875, %v889_v1 }
   0x5   :  { %v89_v18 = vmul.f32 0.5625, %v950_v16  ;;  %v88_v19 = vmul.f32 0.5625, %v955_v17  ;;  %v964_v20 = vld [vmem:[%s1558_s0 + $0x58] sm:$0x3]  ;;  %v969_v21 = vld [vmem:[%s1558_s0 + $0x50] sm:$0xff]  ;;  %v978_v24 = vld [vmem:[%s1558_s0 + $0x68] sm:$0xff] }
   0x6   :  { %v91_v22 = vmul.f32 0.5625, %v964_v20  ;;  %v90_v23 = vmul.f32 0.5625, %v969_v21  ;;  %v983_v25 = vld [vmem:[%s1558_s0 + $0x60] sm:$0xff]  ;;  %v93_v26 = vmul.f32 0.5625, %v978_v24  ;;  %v992_v28 = vld [vmem:[%s1558_s0 + $0x78] sm:$0xff]  ;;  %v1025_v37 = vld [vmem:[%s1558_s0 + $0x90] sm:$0xff] }
   0x7   :  { %v92_v27 = vmul.f32 0.5625, %v983_v25  ;;  %v997_v29 = vld [vmem:[%s1558_s0 + $0x70] sm:$0x3]  ;;  %v95_v30 = vmul.f32 0.5625, %v992_v28  ;;  %v1006_v32 = vld [vmem:[%s1558_s0 + $0x88] sm:$0x3] }
   0x8   :  { %134 = vrot.lane.b32.xlu1 %v912_v6, %s867_s14  ;;  %130 = vrot.lane.b32.xlu0 %v915_v7, %s867_s14  ;;  %v94_v31 = vmul.f32 0.5625, %v997_v29  ;;  %v1011_v33 = vld [vmem:[%s1558_s0 + $0x80] sm:$0xff]  ;;  %v97_v34 = vmul.f32 0.5625, %v1006_v32  ;;  %v1020_v36 = vld [vmem:[%s1558_s0 + $0x98] sm:$0xff]  ;;  %v98_v39 = vmul.f32 0.5625, %v1025_v37  ;;  %v33_v49 = vmul.f32 0.1875, %v905_v5 }
   0x9   :  { %v96_v35 = vmul.f32 0.5625, %v1011_v33  ;;  %v99_v38 = vmul.f32 0.5625, %v1020_v36  ;;  %v1034_v40 = vld [vmem:[%s1558_s0 + $0xa8] sm:$0xff]  ;;  %v1039_v41 = vld [vmem:[%s1558_s0 + $0xa0] sm:$0x3]  ;;  %v1053_v45 = vld [vmem:[%s1558_s0 + $0xb0] sm:$0xff] }
   0xa   :  { %v101_v42 = vmul.f32 0.5625, %v1034_v40  ;;  %v100_v43 = vmul.f32 0.5625, %v1039_v41  ;;  %v1048_v44 = vld [vmem:[%s1558_s0 + $0xb8] sm:$0x3]  ;;  %v102_v47 = vmul.f32 0.5625, %v1053_v45  ;;  %v34_v50 = vmul.f32 0.1875, %v884_v0 }
   0xb   :  { %v103_v46 = vmul.f32 0.5625, %v1048_v44  ;;  %s869_s0 = smov 125   ;;  %v35_v51 = vmul.f32 0.1875, %v894_v2  ;;  %v37_v52 = vmul.f32 0.1875, %v920_v8  ;;  %v36_v53 = vmul.f32 0.1875, %v925_v9 }
   0xc   :  { %138 = vrot.lane.b32.xlu1 %v85_v10, %s867_s14  ;;  %136 = vrot.lane.b32.xlu0 %v84_v11, %s867_s14  ;;  %v39_v54 = vmul.f32 0.1875, %v936_v12  ;;  %v38_v55 = vmul.f32 0.1875, %v941_v13  ;;  %v41_v56 = vmul.f32 0.1875, %v950_v16  ;;  %v40_v57 = vmul.f32 0.1875, %v955_v17 }
   0xd   :  { %v43_v58 = vmul.f32 0.1875, %v964_v20  ;;  %v42_v59 = vmul.f32 0.1875, %v969_v21  ;;  %v45_v0 = vmul.f32 0.1875, %v978_v24  ;;  %v44_v1 = vmul.f32 0.1875, %v983_v25 }
   0xe   :  { %v49_v12 = vmul.f32 0.1875, %v1006_v32  ;;  %v48_v13 = vmul.f32 0.1875, %v1011_v33  ;;  %v53_v24 = vmul.f32 0.1875, %v1034_v40  ;;  %v52_v25 = vmul.f32 0.1875, %v1039_v41 }
  0x10   :  { %142 = vrot.lane.b32.xlu1 %v87_v14, %s867_s14  ;;  %140 = vrot.lane.b32.xlu0 %v86_v15, %s867_s14 }
  0x14   :  { %146 = vrot.lane.b32.xlu1 %v89_v18, %s867_s14  ;;  %144 = vrot.lane.b32.xlu0 %v88_v19, %s867_s14 }
  0x18   :  { %150 = vrot.lane.b32.xlu1 %v91_v22, %s867_s14  ;;  %148 = vrot.lane.b32.xlu0 %v90_v23, %s867_s14 }
  0x1c   :  { %154 = vrot.lane.b32.xlu1 %v93_v26, %s867_s14  ;;  %152 = vrot.lane.b32.xlu0 %v92_v27, %s867_s14 }
  0x20   :  { %158 = vrot.lane.b32.xlu1 %v95_v30, %s867_s14  ;;  %156 = vrot.lane.b32.xlu0 %v94_v31, %s867_s14 }
  0x24   :  { %162 = vrot.lane.b32.xlu1 %v97_v34, %s867_s14  ;;  %160 = vrot.lane.b32.xlu0 %v96_v35, %s867_s14 }
  0x28   :  { %166 = vrot.lane.b32.xlu1 %v99_v38, %s867_s14  ;;  %164 = vrot.lane.b32.xlu0 %v98_v39, %s867_s14 }
  0x2c   :  { %170 = vrot.lane.b32.xlu1 %v101_v42, %s867_s14  ;;  %168 = vrot.lane.b32.xlu0 %v100_v43, %s867_s14 }
  0x30   :  { %174 = vrot.lane.b32.xlu1 %v103_v46, %s867_s14  ;;  %172 = vrot.lane.b32.xlu0 %v102_v47, %s867_s14  ;;  %s870_s14 = smov 32  }
  0x34   :  { %226 = vrot.lane.b32.xlu1 %v915_v7, %s868_s27  ;;  %224 = vrot.lane.b32.xlu0 %v900_v4, %s868_s27  ;;  %v46_v7 = vmul.f32 0.1875, %v997_v29 }
  0x38   :  { %230 = vrot.lane.b32.xlu1 %v912_v6, %s868_s27  ;;  %228 = vrot.lane.b32.xlu0 %v897_v3, %s868_s27  ;;  %v47_v6 = vmul.f32 0.1875, %v992_v28 }
  0x3c   :  { %234 = vrot.lane.b32.xlu1 %v85_v10, %s868_s27  ;;  %232 = vrot.lane.b32.xlu0 %v84_v11, %s868_s27 }
  0x40   :  { %238 = vrot.lane.b32.xlu1 %v87_v14, %s868_s27  ;;  %236 = vrot.lane.b32.xlu0 %v86_v15, %s868_s27 }
  0x44   :  { %242 = vrot.lane.b32.xlu1 %v89_v18, %s868_s27  ;;  %240 = vrot.lane.b32.xlu0 %v88_v19, %s868_s27  ;;  %v51_v18 = vmul.f32 0.1875, %v1020_v36  ;;  %v50_v19 = vmul.f32 0.1875, %v1025_v37 }
  0x48   :  { %246 = vrot.lane.b32.xlu1 %v91_v22, %s868_s27  ;;  %244 = vrot.lane.b32.xlu0 %v90_v23, %s868_s27 }
  0x4c   :  { %250 = vrot.lane.b32.xlu1 %v93_v26, %s868_s27  ;;  %248 = vrot.lane.b32.xlu0 %v92_v27, %s868_s27 }
  0x50   :  { %254 = vrot.lane.b32.xlu1 %v95_v30, %s868_s27  ;;  %252 = vrot.lane.b32.xlu0 %v94_v31, %s868_s27  ;;  %v55_v30 = vmul.f32 0.1875, %v1048_v44  ;;  %v54_v31 = vmul.f32 0.1875, %v1053_v45 }
  0x54   :  { %258 = vrot.lane.b32.xlu1 %v97_v34, %s868_s27  ;;  %256 = vrot.lane.b32.xlu0 %v96_v35, %s868_s27 }
  0x58   :  { %262 = vrot.lane.b32.xlu1 %v99_v38, %s868_s27  ;;  %260 = vrot.lane.b32.xlu0 %v98_v39, %s868_s27 }
  0x5c   :  { %266 = vrot.lane.b32.xlu1 %v101_v42, %s868_s27  ;;  %264 = vrot.lane.b32.xlu0 %v100_v43, %s868_s27 }
  0x60   :  { %270 = vrot.lane.b32.xlu1 %v103_v46, %s868_s27  ;;  %268 = vrot.lane.b32.xlu0 %v102_v47, %s868_s27 }
  0x64   :  { %346 = vrot.lane.b32.xlu1 %v33_v49, %s869_s0  ;;  %344 = vrot.lane.b32.xlu0 %v32_v48, %s869_s0 }
  0x68   :  { %350 = vrot.lane.b32.xlu1 %v35_v51, %s869_s0  ;;  %348 = vrot.lane.b32.xlu0 %v34_v50, %s869_s0 }
  0x6c   :  { %354 = vrot.lane.b32.xlu1 %v37_v52, %s869_s0  ;;  %352 = vrot.lane.b32.xlu0 %v36_v53, %s869_s0 }
  0x70   :  { %358 = vrot.lane.b32.xlu1 %v39_v54, %s869_s0  ;;  %356 = vrot.lane.b32.xlu0 %v38_v55, %s869_s0 }
  0x74   :  { %362 = vrot.lane.b32.xlu1 %v41_v56, %s869_s0  ;;  %360 = vrot.lane.b32.xlu0 %v40_v57, %s869_s0 }
  0x76   :  { %v133_v60 = vpop.permute.xlu1 %132  ;;  %v129_v61 = vpop.permute.xlu0 %128 }
  0x77   :  { %v1087_v62 = vadd.f32 %v133_v60, %v34_v50  ;;  %v1089_v63 = vadd.f32 %v129_v61, %v32_v48 }
  0x78   :  { %366 = vrot.lane.b32.xlu1 %v43_v58, %s869_s0  ;;  %364 = vrot.lane.b32.xlu0 %v42_v59, %s869_s0 }
  0x7a   :  { %v135_v2 = vpop.permute.xlu1 %134  ;;  %v131_v3 = vpop.permute.xlu0 %130 }
  0x7b   :  { %v1095_v4 = vadd.f32 %v135_v2, %v35_v51  ;;  %v1097_v5 = vadd.f32 %v131_v3, %v33_v49 }
  0x7c   :  { %370 = vrot.lane.b32.xlu1 %v45_v0, %s869_s0  ;;  %368 = vrot.lane.b32.xlu0 %v44_v1, %s869_s0 }
  0x7e   :  { %v139_v8 = vpop.permute.xlu1 %138  ;;  %v137_v9 = vpop.permute.xlu0 %136 }
  0x7f   :  { %v1103_v10 = vadd.f32 %v139_v8, %v37_v52  ;;  %v1105_v11 = vadd.f32 %v137_v9, %v36_v53 }
  0x80   :  { %374 = vrot.lane.b32.xlu1 %v47_v6, %s869_s0  ;;  %372 = vrot.lane.b32.xlu0 %v46_v7, %s869_s0 }
  0x82   :  { %v143_v14 = vpop.permute.xlu1 %142  ;;  %v141_v15 = vpop.permute.xlu0 %140 }
  0x83   :  { %v1111_v16 = vadd.f32 %v143_v14, %v39_v54  ;;  %v1113_v17 = vadd.f32 %v141_v15, %v38_v55 }
  0x84   :  { %378 = vrot.lane.b32.xlu1 %v49_v12, %s869_s0  ;;  %376 = vrot.lane.b32.xlu0 %v48_v13, %s869_s0 }
  0x86   :  { %v147_v20 = vpop.permute.xlu1 %146  ;;  %v145_v21 = vpop.permute.xlu0 %144 }
  0x87   :  { %v1119_v22 = vadd.f32 %v147_v20, %v41_v56  ;;  %v1121_v23 = vadd.f32 %v145_v21, %v40_v57 }
  0x88   :  { %382 = vrot.lane.b32.xlu1 %v51_v18, %s869_s0  ;;  %380 = vrot.lane.b32.xlu0 %v50_v19, %s869_s0 }
  0x8a   :  { %v151_v26 = vpop.permute.xlu1 %150  ;;  %v149_v27 = vpop.permute.xlu0 %148 }
  0x8b   :  { %v1127_v28 = vadd.f32 %v151_v26, %v43_v58  ;;  %v1129_v29 = vadd.f32 %v149_v27, %v42_v59 }
  0x8c   :  { %386 = vrot.lane.b32.xlu1 %v53_v24, %s869_s0  ;;  %384 = vrot.lane.b32.xlu0 %v52_v25, %s869_s0 }
  0x8e   :  { %v155_v32 = vpop.permute.xlu1 %154  ;;  %v153_v33 = vpop.permute.xlu0 %152 }
  0x8f   :  { %v1135_v34 = vadd.f32 %v155_v32, %v45_v0  ;;  %v1137_v35 = vadd.f32 %v153_v33, %v44_v1 }
  0x90   :  { %390 = vrot.lane.b32.xlu1 %v55_v30, %s869_s0  ;;  %388 = vrot.lane.b32.xlu0 %v54_v31, %s869_s0 }
  0x92   :  { %v159_v36 = vpop.permute.xlu1 %158  ;;  %v157_v37 = vpop.permute.xlu0 %156 }
  0x93   :  { %v1141_v38 = vadd.f32 %v159_v36, %v47_v6  ;;  %v1143_v39 = vadd.f32 %v157_v37, %v46_v7 }
  0x96   :  { %v163_v40 = vpop.permute.xlu1 %162  ;;  %v161_v41 = vpop.permute.xlu0 %160 }
  0x97   :  { %v1145_v42 = vadd.f32 %v163_v40, %v49_v12  ;;  %v1147_v43 = vadd.f32 %v161_v41, %v48_v13 }
  0x9a   :  { %v167_v44 = vpop.permute.xlu1 %166  ;;  %v165_v45 = vpop.permute.xlu0 %164 }
  0x9b   :  { %v1149_v46 = vadd.f32 %v167_v44, %v51_v18  ;;  %v1151_v47 = vadd.f32 %v165_v45, %v50_v19 }
  0x9e   :  { %v171_v48 = vpop.permute.xlu1 %170  ;;  %v169_v49 = vpop.permute.xlu0 %168 }
  0x9f   :  { %v1153_v50 = vadd.f32 %v171_v48, %v53_v24  ;;  %v1155_v51 = vadd.f32 %v169_v49, %v52_v25 }
  0xa2   :  { %v175_v52 = vpop.permute.xlu1 %174  ;;  %v173_v53 = vpop.permute.xlu0 %172 }
  0xa3   :  { %v1157_v54 = vadd.f32 %v175_v52, %v55_v30  ;;  %v1159_v55 = vadd.f32 %v173_v53, %v54_v31 }
  0xa6   :  { %v227_v56 = vpop.permute.xlu1 %226  ;;  %v225_v57 = vpop.permute.xlu0 %224 }
  0xa7   :  { %v297_v26 = vadd.f32 %v227_v56, %v1097_v5  ;;  %v296_v27 = vadd.f32 %v225_v57, %v1089_v63 }
  0xaa   :  { %v231_v58 = vpop.permute.xlu1 %230  ;;  %v229_v59 = vpop.permute.xlu0 %228 }
  0xab   :  { %v299_v30 = vadd.f32 %v231_v58, %v1095_v4  ;;  %v298_v31 = vadd.f32 %v229_v59, %v1087_v62 }
  0xae   :  { %v235_v60 = vpop.permute.xlu1 %234  ;;  %v233_v61 = vpop.permute.xlu0 %232 }
  0xaf   :  { %v301_v32 = vadd.f32 %v235_v60, %v1103_v10  ;;  %v300_v33 = vadd.f32 %v233_v61, %v1105_v11 }
  0xb2   :  { %v239_v0 = vpop.permute.xlu1 %238  ;;  %v237_v1 = vpop.permute.xlu0 %236 }
  0xb3   :  { %v303_v36 = vadd.f32 %v239_v0, %v1111_v16  ;;  %v302_v41 = vadd.f32 %v237_v1, %v1113_v17 }
  0xb6   :  { %v243_v2 = vpop.permute.xlu1 %242  ;;  %v241_v3 = vpop.permute.xlu0 %240 }
  0xb7   :  { %v1170_v44 = vadd.f32 %v243_v2, %v1119_v22  ;;  %v1173_v4 = vadd.f32 %v241_v3, %v1121_v23 }
  0xba   :  { %v247_v6 = vpop.permute.xlu1 %246  ;;  %v245_v7 = vpop.permute.xlu0 %244 }
  0xbb   :  { %v1176_v62 = vadd.f32 %v247_v6, %v1127_v28  ;;  %v1179_v10 = vadd.f32 %v245_v7, %v1129_v29 }
  0xbe   :  { %v251_v8 = vpop.permute.xlu1 %250  ;;  %v249_v9 = vpop.permute.xlu0 %248 }
  0xbf   :  { %v1182_v11 = vadd.f32 %v251_v8, %v1135_v34  ;;  %v1185_v22 = vadd.f32 %v249_v9, %v1137_v35 }
  0xc2   :  { %v255_v12 = vpop.permute.xlu1 %254  ;;  %v253_v13 = vpop.permute.xlu0 %252 }
  0xc3   :  { %v1188_v49 = vadd.f32 %v255_v12, %v1141_v38  ;;  %v1191_v23 = vadd.f32 %v253_v13, %v1143_v39 }
  0xc6   :  { %v259_v14 = vpop.permute.xlu1 %258  ;;  %v257_v15 = vpop.permute.xlu0 %256 }
  0xc7   :  { %v1194_v28 = vadd.f32 %v259_v14, %v1145_v42  ;;  %v1199_v58 = vadd.f32 %v257_v15, %v1147_v43 }
  0xca   :  { %v263_v18 = vpop.permute.xlu1 %262  ;;  %v261_v19 = vpop.permute.xlu0 %260 }
  0xcb   :  { %v1202_v35 = vadd.f32 %v263_v18, %v1149_v46  ;;  %v1205_v38 = vadd.f32 %v261_v19, %v1151_v47 }
  0xce   :  { %v267_v20 = vpop.permute.xlu1 %266  ;;  %v265_v21 = vpop.permute.xlu0 %264 }
  0xcf   :  { %v1209_v42 = vadd.f32 %v267_v20, %v1153_v50  ;;  %v1212_v59 = vadd.f32 %v265_v21, %v1155_v51 }
  0xd2   :  { %v271_v24 = vpop.permute.xlu1 %270  ;;  %v269_v25 = vpop.permute.xlu0 %268 }
  0xd3   :  { %v1221_v3 = vadd.f32 %v271_v24, %v1157_v54  ;;  %v1225_v7 = vadd.f32 %v269_v25, %v1159_v55 }
  0xd6   :  { %v347_v37 = vpop.permute.xlu1 %346  ;;  %v345_v40 = vpop.permute.xlu0 %344 }
  0xd7   :  { %v417_v5 = vadd.f32 %v347_v37, %v297_v26  ;;  %v416_v63 = vadd.f32 %v345_v40, %v296_v27 }
  0xd9   :  { %v441_v16 = vmul.f32 0.33333334, %v417_v5  ;;  %v498_v45 = vrot.slane %v417_v5, 1  ;;  %v440_v17 = vmul.f32 0.33333334, %v416_v63  ;;  %v497_v48 = vrot.slane %v416_v63, 1 }
  0xda   :  { %v351_v29 = vpop.permute.xlu1 %350  ;;  %v349_v52 = vpop.permute.xlu0 %348 }
  0xdb   :  { %v626_v34 = vrot.slane %v441_v16, 1  ;;  %v625_v53 = vrot.slane %v440_v17, 1  ;;  %v1196_v56 = vadd.f32 %v351_v29, %v299_v30  ;;  %v418_v57 = vadd.f32 %v349_v52, %v298_v31 }
  0xdc   :  { %v499_v39 = vsel %vm496_vm0, %v497_v48, %v498_v45 }
  0xdd   :  { %v627_v60 = vsel %vm496_vm0, %v625_v53, %v626_v34  ;;  %v500_v61 = vrot.slane %v418_v57, 1  ;;  %v1216_v43 = vmul.f32 0.33333334, %v1196_v56  ;;  %v593_v46 = vmul.f32 0.33333334, %v418_v57 }
  0xde   :  { %v689_v0 = vadd.f32 %v627_v60, %v416_v63  ;;  %v355_v1 = vpop.permute.xlu1 %354  ;;  %v353_v2 = vpop.permute.xlu0 %352  ;;  %v1218_v47 = vadd.f32 %v499_v39, %v440_v17  ;;  %v502_v8 = vrot.slane %v1196_v56, 1 }
  0xdf   :  { %v421_v50 = vadd.f32 %v355_v1, %v301_v32  ;;  %v420_v6 = vadd.f32 %v353_v2, %v300_v33  ;;  %v501_v51 = vsel %vm496_vm0, %v498_v45, %v500_v61  ;;  %v628_v9 = vrot.slane %v593_v46, 1 }
  0xe0   :  { %v1228_v12 = vadd.f32 %v501_v51, %v441_v16  ;;  %v737_v19 = vrot.slane %v689_v0, 1  ;;  %v630_v54 = vrot.slane %v1216_v43, 1 }
  0xe1   :  { %v505_v13 = vrot.slane %v421_v50, 1  ;;  %v594_v14 = vmul.f32 0.33333334, %v421_v50  ;;  %v443_v15 = vmul.f32 0.33333334, %v420_v6  ;;  %v503_v18 = vrot.slane %v420_v6, 1 }
  0xe2   :  { %v691_v20 = vadd.f32 %v628_v9, %v418_v57  ;;  %v359_v21 = vpop.permute.xlu1 %358  ;;  %v357_v24 = vpop.permute.xlu0 %356  ;;  %v629_v26 = vsel %vm496_vm0, %v626_v34, %v628_v9 }
  0xe3   :  { %v633_v27 = vrot.slane %v594_v14, 1  ;;  %v631_v55 = vrot.slane %v443_v15, 1  ;;  %v1232_v25 = vadd.f32 %v359_v21, %v303_v36  ;;  %v1234_v30 = vadd.f32 %v357_v24, %v302_v41 }
  0xe4   :  { %v740_v31 = vrot.slane %v691_v20, 1  ;;  %v690_v32 = vadd.f32 %v629_v26, %v417_v5  ;;  %v506_v33 = vsel %vm496_vm0, %v503_v18, %v505_v13  ;;  %v504_v37 = vsel %vm496_vm0, %v502_v8, %v503_v18 }
  0xe5   :  { %v694_v40 = vadd.f32 %v633_v27, %v421_v50  ;;  %v634_v63 = vsel %vm496_vm0, %v631_v55, %v633_v27  ;;  %v445_v16 = vmul.f32 0.33333334, %v1232_v25  ;;  %v508_v45 = vrot.slane %v1232_v25, 1 }
  0xe6   :  { %v693_v17 = vadd.f32 %v634_v63, %v420_v6  ;;  %v1242_v48 = vmul.f32 0.33333334, %v1234_v30  ;;  %v507_v36 = vrot.slane %v1234_v30, 1  ;;  %v363_v41 = vpop.permute.xlu1 %362  ;;  %v361_v29 = vpop.permute.xlu0 %360  ;;  %v738_v5 = vrot.slane %v690_v32, 1 }
  0xe7   :  { %v745_v52 = vrot.slane %v694_v40, 1  ;;  %v636_v34 = vrot.slane %v445_v16, 1  ;;  %v1246_v53 = vadd.f32 %v363_v41, %v1170_v44  ;;  %v424_v57 = vadd.f32 %v361_v29, %v1173_v4 }
  0xe8   :  { %v743_v39 = vrot.slane %v693_v17, 1  ;;  %v635_v60 = vrot.slane %v1242_v48, 1  ;;  %v741_v61 = vsel %vm496_vm0, %v738_v5, %v740_v31  ;;  %v739_v0 = vsel %vm496_vm0, %v737_v19, %v738_v5 }
  0xe9   :  { %v1253_v46 = vmul.f32 0.33333334, %v1246_v53  ;;  %v512_v1 = vrot.slane %v1246_v53, 1  ;;  %v510_v2 = vrot.slane %v424_v57, 1  ;;  %v595_v50 = vmul.f32 0.33333334, %v424_v57  ;;  %779 = vrot.lane.b32.xlu1 %v741_v61, %s870_s14  ;;  %777 = vrot.lane.b32.xlu0 %v739_v0, %s870_s14 }
  0xea   :  { %v637_v44 = vsel %vm496_vm0, %v635_v60, %v636_v34  ;;  %v367_v4 = vpop.permute.xlu1 %366  ;;  %v365_v6 = vpop.permute.xlu0 %364  ;;  %v746_v51 = vsel %vm496_vm0, %v743_v39, %v745_v52  ;;  %v632_v8 = vsel %vm496_vm0, %v630_v54, %v631_v55  ;;  %v1261_v9 = vadd.f32 %v506_v33, %v443_v15 }
  0xeb   :  { %v695_v13 = vadd.f32 %v637_v44, %v1234_v30  ;;  %v640_v14 = vrot.slane %v1253_v46, 1  ;;  %v638_v18 = vrot.slane %v595_v50, 1  ;;  %v1266_v19 = vadd.f32 %v367_v4, %v1176_v62 }
  0xec   :  { %v1269_v20 = vadd.f32 %v365_v6, %v1179_v10  ;;  %v692_v21 = vadd.f32 %v632_v8, %v1196_v56  ;;  %v1273_v24 = vadd.f32 %v504_v37, %v1216_v43  ;;  %v511_v15 = vsel %vm496_vm0, %v508_v45, %v510_v2 }
  0xed   :  { %v747_v54 = vrot.slane %v695_v13, 1  ;;  %v697_v26 = vadd.f32 %v638_v18, %v424_v57  ;;  %v515_v27 = vrot.slane %v1266_v19, 1  ;;  %v596_v55 = vmul.f32 0.33333334, %v1266_v19  ;;  %783 = vrot.lane.b32.xlu1 %v746_v51, %s870_s14 }
  0xee   :  { %v1282_v62 = vmul.f32 0.33333334, %v1269_v20  ;;  %v513_v10 = vrot.slane %v1269_v20, 1  ;;  %v742_v56 = vrot.slane %v692_v21, 1  ;;  %v371_v43 = vpop.permute.xlu1 %370  ;;  %v369_v31 = vpop.permute.xlu0 %368  ;;  %v639_v32 = vsel %vm496_vm0, %v636_v34, %v638_v18 }
  0xef   :  { %v750_v33 = vrot.slane %v697_v26, 1  ;;  %v643_v37 = vrot.slane %v596_v55, 1  ;;  %v1287_v40 = vadd.f32 %v371_v43, %v1182_v11  ;;  %v1290_v63 = vadd.f32 %v369_v31, %v1185_v22 }
  0xf0   :  { %v641_v17 = vrot.slane %v1282_v62, 1  ;;  %v744_v41 = vsel %vm496_vm0, %v742_v56, %v743_v39  ;;  %v696_v29 = vadd.f32 %v639_v32, %v1232_v25  ;;  %v1295_v5 = vadd.f32 %v511_v15, %v445_v16 }
  0xf1   :  { %v700_v52 = vadd.f32 %v643_v37, %v1266_v19  ;;  %781 = vrot.lane.b32.xlu0 %v744_v41, %s870_s14  ;;  %v1300_v34 = vmul.f32 0.33333334, %v1287_v40  ;;  %v518_v11 = vrot.slane %v1287_v40, 1  ;;  %v1304_v22 = vmul.f32 0.33333334, %v1290_v63 }
  0xf2   :  { %v644_v57 = vsel %vm496_vm0, %v641_v17, %v643_v37  ;;  %v517_v39 = vrot.slane %v1290_v63, 1  ;;  %v375_v60 = vpop.permute.xlu1 %374  ;;  %v373_v61 = vpop.permute.xlu0 %372  ;;  %v748_v16 = vrot.slane %v696_v29, 1  ;;  %v642_v0 = vsel %vm496_vm0, %v640_v14, %v641_v17 }
  0xf3   :  { %v755_v2 = vrot.slane %v700_v52, 1  ;;  %v699_v50 = vadd.f32 %v644_v57, %v1269_v20  ;;  %v646_v44 = vrot.slane %v1300_v34, 1  ;;  %v645_v4 = vrot.slane %v1304_v22, 1 }
  0xf4   :  { %v1313_v6 = vadd.f32 %v375_v60, %v1188_v49  ;;  %v1316_v51 = vadd.f32 %v373_v61, %v1191_v23  ;;  %v751_v8 = vsel %vm496_vm0, %v748_v16, %v750_v33  ;;  %v749_v13 = vsel %vm496_vm0, %v747_v54, %v748_v16 }
  0xf5   :  { %v753_v18 = vrot.slane %v699_v50, 1  ;;  %v647_v14 = vsel %vm496_vm0, %v645_v4, %v646_v44  ;;  %787 = vrot.lane.b32.xlu1 %v751_v8, %s870_s14  ;;  %785 = vrot.lane.b32.xlu0 %v749_v13, %s870_s14  ;;  %v698_v21 = vadd.f32 %v642_v0, %v1246_v53  ;;  %v509_v49 = vsel %vm496_vm0, %v507_v36, %v508_v45 }
  0xf6   :  { %v1330_v23 = vadd.f32 %v647_v14, %v1290_v63  ;;  %v1333_v15 = vmul.f32 0.33333334, %v1313_v6  ;;  %v522_v54 = vrot.slane %v1313_v6, 1  ;;  %v520_v26 = vrot.slane %v1316_v51, 1  ;;  %v379_v55 = vpop.permute.xlu1 %378  ;;  %v377_v56 = vpop.permute.xlu0 %376 }
  0xf7   :  { %v597_v43 = vmul.f32 0.33333334, %v1316_v51  ;;  %v1339_v25 = vadd.f32 %v379_v55, %v1194_v28  ;;  %v1342_v30 = vadd.f32 %v377_v56, %v1199_v58  ;;  %v756_v45 = vsel %vm496_vm0, %v753_v18, %v755_v2 }
  0xf8   :  { %v757_v36 = vrot.slane %v1330_v23, 1  ;;  %v650_v31 = vrot.slane %v1333_v15, 1  ;;  %v752_v32 = vrot.slane %v698_v21, 1  ;;  %v1348_v33 = vadd.f32 %v509_v49, %v1242_v48 }
  0xf9   :  { %v648_v37 = vrot.slane %v597_v43, 1  ;;  %v525_v17 = vrot.slane %v1339_v25, 1  ;;  %v598_v41 = vmul.f32 0.33333334, %v1339_v25  ;;  %v1353_v28 = vmul.f32 0.33333334, %v1342_v30  ;;  %791 = vrot.lane.b32.xlu1 %v756_v45, %s870_s14 }
  0xfa   :  { %v523_v58 = vrot.slane %v1342_v30, 1  ;;  %v754_v29 = vsel %vm496_vm0, %v752_v32, %v753_v18  ;;  %v383_v52 = vpop.permute.xlu1 %382  ;;  %v381_v57 = vpop.permute.xlu0 %380  ;;  %v516_v48 = vsel %vm496_vm0, %v513_v10, %v515_v27  ;;  %v514_v60 = vsel %vm496_vm0, %v512_v1, %v513_v10 }
  0xfb   :  { %v703_v61 = vadd.f32 %v648_v37, %v1316_v51  ;;  %v653_v16 = vrot.slane %v598_v41, 1  ;;  %v651_v0 = vrot.slane %v1353_v28, 1  ;;  %789 = vrot.lane.b32.xlu0 %v754_v29, %s870_s14  ;;  %v1372_v2 = vadd.f32 %v383_v52, %v1202_v35 }
  0xfc   :  { %v1375_v19 = vadd.f32 %v381_v57, %v1205_v38  ;;  %v649_v27 = vsel %vm496_vm0, %v646_v44, %v648_v37  ;;  %v1379_v20 = vadd.f32 %v516_v48, %v1282_v62  ;;  %v1382_v53 = vadd.f32 %v514_v60, %v1253_v46 }
  0xfd   :  { %v760_v1 = vrot.slane %v703_v61, 1  ;;  %v706_v10 = vadd.f32 %v653_v16, %v1339_v25  ;;  %v654_v50 = vsel %vm496_vm0, %v651_v0, %v653_v16  ;;  %v1387_v4 = vmul.f32 0.33333334, %v1372_v2 }
  0xfe   :  { %v705_v35 = vadd.f32 %v654_v50, %v1342_v30  ;;  %v528_v38 = vrot.slane %v1372_v2, 1  ;;  %v1392_v44 = vmul.f32 0.33333334, %v1375_v19  ;;  %v527_v62 = vrot.slane %v1375_v19, 1  ;;  %v387_v8 = vpop.permute.xlu1 %386  ;;  %v385_v46 = vpop.permute.xlu0 %384 }
  0xff   :  { %v765_v13 = vrot.slane %v706_v10, 1  ;;  %v656_v18 = vrot.slane %v1387_v4, 1  ;;  %v1397_v14 = vadd.f32 %v387_v8, %v1209_v42  ;;  %v436_v21 = vadd.f32 %v385_v46, %v1212_v59 }
 0x100   :  { %v763_v49 = vrot.slane %v705_v35, 1  ;;  %v655_v23 = vrot.slane %v1392_v44, 1  ;;  %v702_v55 = vadd.f32 %v649_v27, %v1287_v40  ;;  %v652_v56 = vsel %vm496_vm0, %v650_v31, %v651_v0 }
 0x101   :  { %v454_v43 = vmul.f32 0.33333334, %v1397_v14  ;;  %v532_v45 = vrot.slane %v1397_v14, 1  ;;  %v530_v32 = vrot.slane %v436_v21, 1  ;;  %v599_v37 = vmul.f32 0.33333334, %v436_v21 }
 0x102   :  { %v657_v41 = vsel %vm496_vm0, %v655_v23, %v656_v18  ;;  %v758_v29 = vrot.slane %v702_v55, 1  ;;  %v391_v42 = vpop.permute.xlu1 %390  ;;  %v389_v52 = vpop.permute.xlu0 %388  ;;  %v766_v59 = vsel %vm496_vm0, %v763_v49, %v765_v13  ;;  %v704_v57 = vadd.f32 %v652_v56, %v1313_v6 }
 0x103   :  { %v707_v48 = vadd.f32 %v657_v41, %v1375_v19  ;;  %v660_v60 = vrot.slane %v454_v43, 1  ;;  %v658_v61 = vrot.slane %v599_v37, 1  ;;  %v439_v31 = vadd.f32 %v391_v42, %v1221_v3 }
 0x104   :  { %v761_v16 = vsel %vm496_vm0, %v758_v29, %v760_v1  ;;  %v759_v0 = vsel %vm496_vm0, %v757_v36, %v758_v29  ;;  %v438_v27 = vadd.f32 %v389_v52, %v1225_v7  ;;  %v762_v10 = vrot.slane %v704_v57, 1 }
 0x105   :  { %v767_v50 = vrot.slane %v707_v48, 1  ;;  %v709_v35 = vadd.f32 %v658_v61, %v436_v21  ;;  %795 = vrot.lane.b32.xlu1 %v761_v16, %s870_s14  ;;  %793 = vrot.lane.b32.xlu0 %v759_v0, %s870_s14  ;;  %v535_v8 = vrot.slane %v439_v31, 1  ;;  %v600_v46 = vmul.f32 0.33333334, %v439_v31 }
 0x106   :  { %v455_v13 = vmul.f32 0.33333334, %v438_v27  ;;  %v533_v23 = vrot.slane %v438_v27, 1  ;;  %v764_v55 = vsel %vm496_vm0, %v762_v10, %v763_v49  ;;  %v659_v3 = vsel %vm496_vm0, %v656_v18, %v658_v61 }
 0x107   :  { %v770_v1 = vrot.slane %v709_v35, 1  ;;  %v663_v56 = vrot.slane %v600_v46, 1  ;;  %v708_v36 = vadd.f32 %v659_v3, %v1372_v2  ;;  %v521_v7 = vsel %vm496_vm0, %v518_v11, %v520_v26 }
 0x108   :  { %v661_v21 = vrot.slane %v455_v13, 1  ;;  %v1424_v37 = vadd.f32 %v521_v7, %v1300_v34  ;;  %v519_v18 = vsel %vm496_vm0, %v517_v39, %v518_v11  ;;  %v526_v51 = vsel %vm496_vm0, %v523_v58, %v525_v17 }
 0x109   :  { %v712_v49 = vadd.f32 %v663_v56, %v439_v31  ;;  %799 = vrot.lane.b32.xlu1 %v766_v59, %s870_s14  ;;  %797 = vrot.lane.b32.xlu0 %v764_v55, %s870_s14  ;;  %v768_v26 = vrot.slane %v708_v36, 1  ;;  %v561_v34 = vadd.f32 %v519_v18, %v1304_v22  ;;  %v564_v40 = vadd.f32 %v526_v51, %v1353_v28 }
 0x10a   :  { %v664_v63 = vsel %vm496_vm0, %v661_v21, %v663_v56  ;;  %v662_v11 = vsel %vm496_vm0, %v660_v60, %v661_v21  ;;  %v524_v39 = vsel %vm496_vm0, %v522_v54, %v523_v58  ;;  %v531_v25 = vsel %vm496_vm0, %v528_v38, %v530_v32 }
 0x10b   :  { %v775_v17 = vrot.slane %v712_v49, 1  ;;  %v711_v41 = vadd.f32 %v664_v63, %v438_v27  ;;  %v771_v22 = vsel %vm496_vm0, %v768_v26, %v770_v1  ;;  %v769_v28 = vsel %vm496_vm0, %v767_v50, %v768_v26 }
 0x10c   :  { %v710_v29 = vadd.f32 %v662_v11, %v1397_v14  ;;  %v563_v42 = vadd.f32 %v524_v39, %v1333_v15  ;;  %v566_v30 = vadd.f32 %v531_v25, %v1387_v4  ;;  %v529_v6 = vsel %vm496_vm0, %v527_v62, %v528_v38 }
 0x10d   :  { %v773_v54 = vrot.slane %v711_v41, 1  ;;  %803 = vrot.lane.b32.xlu1 %v771_v22, %s870_s14  ;;  %801 = vrot.lane.b32.xlu0 %v769_v28, %s870_s14  ;;  %v565_v58 = vadd.f32 %v529_v6, %v1392_v44  ;;  %v536_v32 = vsel %vm496_vm0, %v533_v23, %v535_v8  ;;  %v534_v14 = vsel %vm496_vm0, %v532_v45, %v533_v23 }
 0x10e   :  { %v772_v15 = vrot.slane %v710_v29, 1  ;;  %v568_v52 = vadd.f32 %v536_v32, %v455_v13  ;;  %v567_v4 = vadd.f32 %v534_v14, %v454_v43 }
 0x10f   :  { %v776_v2 = vsel %vm496_vm0, %v773_v54, %v775_v17 }
 0x110   :  { %v774_v19 = vsel %vm496_vm0, %v772_v15, %v773_v54 }
 0x111   :  { %807 = vrot.lane.b32.xlu1 %v776_v2, %s870_s14  ;;  %805 = vrot.lane.b32.xlu0 %v774_v19, %s870_s14 }
 0x15b   :  { %v780_v38 = vpop.permute.xlu1 %779  ;;  %v778_v62 = vpop.permute.xlu0 %777 }
 0x15c   :  { %v827_v44 = vsel %vm825_vm1, %v1228_v12, %v780_v38  ;;  %v826_v45 = vsel %vm825_vm1, %v1218_v47, %v778_v62 }
 0x15d   :  { %844 = vst.msk [vmem:[%s1559_s1 + $0x8] sm:$0xff] %vm842_vm2, %v827_v44  ;;  %843 = vst.msk [vmem:[%s1559_s1] sm:$0xff] %vm842_vm2, %v826_v45 }
 0x15f   :  { %v784_v43 = vpop.permute.xlu1 %783 }
 0x160   :  { %v829_v59 = vsel %vm825_vm1, %v1261_v9, %v784_v43 }
 0x161   :  { %846 = vst.msk [vmem:[%s1559_s1 + $0x18] sm:$0xff] %vm842_vm2, %v829_v59 }
 0x163   :  { %v782_v47 = vpop.permute.xlu0 %781 }
 0x164   :  { %v828_v12 = vsel %vm825_vm1, %v1273_v24, %v782_v47 }
 0x165   :  { %845 = vst.msk [vmem:[%s1559_s1 + $0x10] sm:$0xff] %vm842_vm2, %v828_v12 }
 0x167   :  { %v788_v57 = vpop.permute.xlu1 %787  ;;  %v786_v48 = vpop.permute.xlu0 %785 }
 0x168   :  { %v831_v60 = vsel %vm825_vm1, %v1295_v5, %v788_v57  ;;  %v830_v9 = vsel %vm825_vm1, %v1348_v33, %v786_v48 }
 0x169   :  { %848 = vst.msk [vmem:[%s1559_s1 + $0x28] sm:$0xff] %vm842_vm2, %v831_v60  ;;  %847 = vst.msk [vmem:[%s1559_s1 + $0x20] sm:$0xff] %vm842_vm2, %v830_v9 }
 0x16b   :  { %v792_v24 = vpop.permute.xlu1 %791 }
 0x16c   :  { %v833_v61 = vsel %vm825_vm1, %v1379_v20, %v792_v24 }
 0x16d   :  { %850 = vst.msk [vmem:[%s1559_s1 + $0x38] sm:$0xff] %vm842_vm2, %v833_v61  ;;  %v790_v5 = vpop.permute.xlu0 %789 }
 0x16e   :  { %v832_v33 = vsel %vm825_vm1, %v1382_v53, %v790_v5 }
 0x16f   :  { %849 = vst.msk [vmem:[%s1559_s1 + $0x30] sm:$0xff] %vm842_vm2, %v832_v33 }
 0x177   :  { %v796_v31 = vpop.permute.xlu1 %795  ;;  %v794_v16 = vpop.permute.xlu0 %793 }
 0x178   :  { %v835_v0 = vsel %vm825_vm1, %v1424_v37, %v796_v31  ;;  %v834_v20 = vsel %vm825_vm1, %v561_v34, %v794_v16 }
 0x179   :  { %852 = vst.msk [vmem:[%s1559_s1 + $0x48] sm:$0xff] %vm842_vm2, %v835_v0  ;;  %851 = vst.msk [vmem:[%s1559_s1 + $0x40] sm:$0xff] %vm842_vm2, %v834_v20 }
 0x17b   :  { %v800_v53 = vpop.permute.xlu1 %799  ;;  %v798_v27 = vpop.permute.xlu0 %797 }
 0x17c   :  { %v837_v10 = vsel %vm825_vm1, %v564_v40, %v800_v53  ;;  %v836_v50 = vsel %vm825_vm1, %v563_v42, %v798_v27 }
 0x17d   :  { %854 = vst.msk [vmem:[%s1559_s1 + $0x58] sm:$0xff] %vm842_vm2, %v837_v10  ;;  %853 = vst.msk [vmem:[%s1559_s1 + $0x50] sm:$0xff] %vm842_vm2, %v836_v50 }
 0x17f   :  { %v804_v35 = vpop.permute.xlu1 %803  ;;  %v802_v8 = vpop.permute.xlu0 %801 }
 0x180   :  { %v839_v46 = vsel %vm825_vm1, %v566_v30, %v804_v35  ;;  %v838_v13 = vsel %vm825_vm1, %v565_v58, %v802_v8 }
 0x181   :  { %856 = vst.msk [vmem:[%s1559_s1 + $0x68] sm:$0xff] %vm842_vm2, %v839_v46  ;;  %855 = vst.msk [vmem:[%s1559_s1 + $0x60] sm:$0xff] %vm842_vm2, %v838_v13 }
 0x183   :  { %v808_v23 = vpop.permute.xlu1 %807  ;;  %v806_v55 = vpop.permute.xlu0 %805 }
 0x184   :  { %v841_v3 = vsel %vm825_vm1, %v568_v52, %v808_v23  ;;  %v840_v1 = vsel %vm825_vm1, %v567_v4, %v806_v55 }
 0x185   :  { %858 = vst.msk [vmem:[%s1559_s1 + $0x78] sm:$0xff] %vm842_vm2, %v841_v3  ;;  %857 = vst.msk [vmem:[%s1559_s1 + $0x70] sm:$0xff] %vm842_vm2, %v840_v1 }

</bundles_post_ra>
